<compile_context>
chip_gen: v6e
topology: v6e:2x2x1
jax: 0.10.0
libtpu: 0.0.40
codegen_flags: <defaults>
</compile_context>

<pallas_src>
import math

import jax
import jax.numpy as jnp
from jax.experimental import pallas as pl
from jax.experimental.pallas import tpu as pltpu

# ---- model hyperparameters (small, consistent with the module) ----
B = 2            # batch
N = 8            # sequence length (tokens)
D = 32           # hidden_d
H = 2            # n_heads
DH = D // H      # d_head
MLP_RATIO = 4
DM = MLP_RATIO * D
BN = B * N       # flattened token count
SC = H * BN      # concatenated score-matrix column count ([head0 | head1])
EPS = 1e-5       # nn.LayerNorm default
NEG_INF = -1e30  # additive mask value


def _layernorm(x, gamma, beta):
    mu = jnp.mean(x, axis=-1, keepdims=True)
    var = jnp.mean((x - mu) ** 2, axis=-1, keepdims=True)
    return (x - mu) * jax.lax.rsqrt(var + EPS) * gamma + beta


def _gelu_exact(x):
    # PyTorch nn.GELU() default (erf formulation)
    return 0.5 * x * (1.0 + jax.lax.erf(x * (1.0 / math.sqrt(2.0))))


def vit_block_kernel(x_ref, wqkv_ref, bqkv_ref, nvec_ref, hmask_ref,
                     smask_ref, abias_ref, w1_ref, b1_ref, w2_ref, o_ref):
    x = x_ref[...]                        # (BN, D) = (16, 32): all tokens of all batches
    nv = nvec_ref[...]                    # (5, D): ln1g, ln1b, ln2g, ln2b, b2
    ln1g, ln1b = nv[0:1, :], nv[1:2, :]
    ln2g, ln2b = nv[2:3, :], nv[3:4, :]
    b2 = nv[4:5, :]

    # ---- LayerNorm 1 (per token, batch-flattened) ----
    xn = _layernorm(x, ln1g, ln1b)

    # ---- fused QKV: single (16,32)@(32,96) MXU push, then static lane slices ----
    qkv = jnp.dot(xn, wqkv_ref[...], preferred_element_type=jnp.float32) + bqkv_ref[...]
    q = qkv[:, 0:D]                       # (16, 32)
    k = qkv[:, D:2 * D]
    v = qkv[:, 2 * D:3 * D]

    # ---- per-head masking + sublane concat: Kcat/Vcat hold both heads' key/value rows ----
    hm = hmask_ref[...]                   # (H, D) multiplicative feature masks (precomputed)
    kcat = jnp.concatenate([k * hm[0:1, :], k * hm[1:2, :]], axis=0)   # (2*BN, D) = (32, 32)
    vcat = jnp.concatenate([v * hm[0:1, :], v * hm[1:2, :]], axis=0)   # (32, 32)

    # ---- one score matmul for both heads: columns = [head0 keys | head1 keys] ----
    s = jax.lax.dot_general(q, kcat, (((1,), (1,)), ((), ())),
                            preferred_element_type=jnp.float32)        # (16, 32)
    s = s * (1.0 / math.sqrt(DH)) + abias_ref[...]   # additive cross-batch mask (precomputed)

    # ---- segmented softmax over the two 16-column halves (one per head) ----
    sm = smask_ref[...]                   # (4, SC): seg0, seg1, negseg0, negseg1 (precomputed)
    seg0, seg1 = sm[0:1, :], sm[1:2, :]
    neg0, neg1 = sm[2:3, :], sm[3:4, :]
    m0 = jnp.max(s + neg0, axis=-1, keepdims=True)    # per-row max of head-0 half
    m1 = jnp.max(s + neg1, axis=-1, keepdims=True)    # per-row max of head-1 half
    e = jnp.exp(s - (seg0 * m0 + seg1 * m1))          # cross-batch cols underflow to exactly 0
    l0 = jnp.sum(e * seg0, axis=-1, keepdims=True)
    l1 = jnp.sum(e * seg1, axis=-1, keepdims=True)
    p = e * (seg0 / l0 + seg1 / l1)       # EXACT division (review correctness note; cost ~0 here)

    # ---- one P@V matmul: head contributions land in disjoint feature columns ----
    msa = jnp.dot(p, vcat, preferred_element_type=jnp.float32)         # (16, 32)

    out1 = x + msa                        # residual 1

    # ---- LayerNorm 2 + MLP ----
    yn = _layernorm(out1, ln2g, ln2b)
    h1 = jnp.dot(yn, w1_ref[...], preferred_element_type=jnp.float32) + b1_ref[...]  # (16, 128)
    g = _gelu_exact(h1)
    h2 = jnp.dot(g, w2_ref[...], preferred_element_type=jnp.float32) + b2            # (16, 32)

    o_ref[...] = out1 + h2                # residual 2


def pack_params(params):
    """Pack the 14 PyTorch-style parameters + constant masks into 9 kernel operands.

    INVARIANT: the kernel's head trick (feature masks on K/V + a single flattened score matmul)
    relies on each D x D Q/K/V projection being EXACTLY block-diagonal per head. Do not change
    this packing without also changing the attention path in the kernel.
    """
    (ln1g, ln1b, wq, bq, wk, bk, wv, bv, ln2g, ln2b, w1, b1, w2, b2) = params

    def block_diag(w_heads):              # (H, DH, DH) -> (D, D), block-diagonal
        m = jnp.zeros((D, D), jnp.float32)
        for h in range(H):
            m = m.at[h * DH:(h + 1) * DH, h * DH:(h + 1) * DH].set(w_heads[h])
        return m

    wqkv = jnp.concatenate(
        [block_diag(wq), block_diag(wk), block_diag(wv)], axis=1)       # (D, 3D) = (32, 96)
    bqkv = jnp.concatenate(
        [bq.reshape(D), bk.reshape(D), bv.reshape(D)]).reshape(1, 3 * D)  # (1, 96)
    nvecs = jnp.stack([ln1g, ln1b, ln2g, ln2b, b2])                      # (5, D)

    # per-head feature masks (which hidden columns belong to head h)
    feat_head = jnp.arange(D) // DH
    hmask = jnp.stack([feat_head == h for h in range(H)]).astype(jnp.float32)   # (H, D)

    # segment masks over the concatenated score columns (head h owns cols [h*BN, (h+1)*BN))
    col_head = jnp.arange(SC) // BN
    seg = jnp.stack([col_head == h for h in range(H)]).astype(jnp.float32)      # (H, SC)
    negseg = (1.0 - seg) * NEG_INF                                               # additive
    smask = jnp.concatenate([seg, negseg], axis=0)                               # (2H, SC)

    # additive cross-batch attention mask, tiled for both head halves
    q_batch = (jnp.arange(BN) // N)[:, None]                                     # (BN, 1)
    k_batch = ((jnp.arange(SC) % BN) // N)[None, :]                              # (1, SC)
    abias = jnp.where(q_batch == k_batch, 0.0, NEG_INF).astype(jnp.float32)      # (BN, SC)

    return (wqkv, bqkv, nvecs, hmask, smask, abias, w1, b1.reshape(1, DM), w2)


def vit_block(x, packed):
    wqkv, bqkv, nvecs, hmask, smask, abias, w1, b1, w2 = packed
    x_flat = x.reshape(BN, D)             # flatten (B, N) -> better sublane fill
    out_flat = pl.pallas_call(
        vit_block_kernel,
        out_shape=jax.ShapeDtypeStruct((BN, D), jnp.float32),
        # no grid: a single kernel step, every operand fully resident in VMEM
        in_specs=[pl.BlockSpec(memory_space=pltpu.MemorySpace.VMEM)] * 9
                 + [pl.BlockSpec(memory_space=pltpu.MemorySpace.VMEM)],
        out_specs=pl.BlockSpec(memory_space=pltpu.MemorySpace.VMEM),
    )(x_flat, wqkv, bqkv, nvecs, hmask, smask, abias, w1, b1, w2)
    return out_flat.reshape(B, N, D)


def vit_block_ref(x, params):
    """Pure-JAX reference with the original per-head semantics (correctness check)."""
    (ln1g, ln1b, wq, bq, wk, bk, wv, bv, ln2g, ln2b, w1, b1, w2, b2) = params
    xn = _layernorm(x, ln1g, ln1b)
    outs = []
    for h in range(H):
        seq = xn[:, :, h * DH:(h + 1) * DH]
        q = seq @ wq[h] + bq[h]
        k = seq @ wk[h] + bk[h]
        v = seq @ wv[h] + bv[h]
        scores = jnp.einsum("bnd,bmd->bnm", q, k) / math.sqrt(DH)
        attn = jax.nn.softmax(scores, axis=-1)
        outs.append(jnp.einsum("bnm,bmd->bnd", attn, v))
    msa = jnp.concatenate(outs, axis=-1)
    out1 = x + msa
    yn = _layernorm(out1, ln2g, ln2b)
    h1 = yn @ w1 + b1
    g = _gelu_exact(h1)
    return out1 + g @ w2 + b2


def init_params(key):
    ks = jax.random.split(key, 16)
    s = 0.05
    ln1g = jnp.ones((D,), jnp.float32)
    ln1b = jnp.zeros((D,), jnp.float32)
    ln2g = jnp.ones((D,), jnp.float32)
    ln2b = jnp.zeros((D,), jnp.float32)
    # per-head q/k/v weights, stored as (H, in=DH, out=DH) ("transposed" vs. torch
    # nn.Linear's (out, in) layout so the math is seq @ W + b)
    wq = s * jax.random.normal(ks[0], (H, DH, DH), jnp.float32)
    bq = s * jax.random.normal(ks[1], (H, DH), jnp.float32)
    wk = s * jax.random.normal(ks[2], (H, DH, DH), jnp.float32)
    bk = s * jax.random.normal(ks[3], (H, DH), jnp.float32)
    wv = s * jax.random.normal(ks[4], (H, DH, DH), jnp.float32)
    bv = s * jax.random.normal(ks[5], (H, DH), jnp.float32)
    # MLP weights, (in, out)
    w1 = s * jax.random.normal(ks[6], (D, DM), jnp.float32)
    b1 = s * jax.random.normal(ks[7], (DM,), jnp.float32)
    w2 = s * jax.random.normal(ks[8], (DM, D), jnp.float32)
    b2 = s * jax.random.normal(ks[9], (D,), jnp.float32)
    return (ln1g, ln1b, wq, bq, wk, bk, wv, bv, ln2g, ln2b, w1, b1, w2, b2)


if __name__ == "__main__":
    key = jax.random.PRNGKey(0)
    kx, kp = jax.random.split(key)
    x = jax.random.normal(kx, (B, N, D), jnp.float32)
    params = init_params(kp)

    packed = pack_params(params)          # one-time wrapper-side packing (weights + const masks)
    out = vit_block(x, packed)
    out = jax.block_until_ready(out)

    ref = vit_block_ref(x, params)
    assert out.shape == (B, N, D)
    # exact softmax division now -> tighter tolerance than the previous approx-reciprocal version
    assert jnp.allclose(out, ref, atol=1e-4, rtol=1e-4), "mismatch vs reference"
    print("KERNEL_OK")
</pallas_src>

<mosaic_0001>
module attributes {stable_mosaic.version = 11 : i64} {
  func.func @vit_block_kernel(%arg0: memref<16x32xf32, #tpu.memory_space<vmem>>, %arg1: memref<32x96xf32, #tpu.memory_space<vmem>>, %arg2: memref<1x96xf32, #tpu.memory_space<vmem>>, %arg3: memref<5x32xf32, #tpu.memory_space<vmem>>, %arg4: memref<2x32xf32, #tpu.memory_space<vmem>>, %arg5: memref<4x32xf32, #tpu.memory_space<vmem>>, %arg6: memref<16x32xf32, #tpu.memory_space<vmem>>, %arg7: memref<32x128xf32, #tpu.memory_space<vmem>>, %arg8: memref<1x128xf32, #tpu.memory_space<vmem>>, %arg9: memref<128x32xf32, #tpu.memory_space<vmem>>, %arg10: memref<16x32xf32, #tpu.memory_space<vmem>>) attributes {dimension_semantics = [], scalar_prefetch = 0 : i64, scratch_operands = 0 : i64, tpu.core_type = #tpu.core_type<tc>} {
    %c0 = arith.constant 0 : index
    %c0_0 = arith.constant 0 : index
    %0 = vector.load %arg0[%c0, %c0_0] : memref<16x32xf32, #tpu.memory_space<vmem>>, vector<16x32xf32>
    %c0_1 = arith.constant 0 : index
    %c0_2 = arith.constant 0 : index
    %1 = vector.load %arg3[%c0_1, %c0_2] : memref<5x32xf32, #tpu.memory_space<vmem>>, vector<5x32xf32>
    %2 = vector.extract_strided_slice %1 {offsets = [0, 0], sizes = [1, 32], strides = [1, 1]} : vector<5x32xf32> to vector<1x32xf32>
    %3 = vector.extract_strided_slice %1 {offsets = [1, 0], sizes = [1, 32], strides = [1, 1]} : vector<5x32xf32> to vector<1x32xf32>
    %4 = vector.extract_strided_slice %1 {offsets = [2, 0], sizes = [1, 32], strides = [1, 1]} : vector<5x32xf32> to vector<1x32xf32>
    %5 = vector.extract_strided_slice %1 {offsets = [3, 0], sizes = [1, 32], strides = [1, 1]} : vector<5x32xf32> to vector<1x32xf32>
    %6 = vector.extract_strided_slice %1 {offsets = [4, 0], sizes = [1, 32], strides = [1, 1]} : vector<5x32xf32> to vector<1x32xf32>
    %cst = arith.constant dense<0.000000e+00> : vector<16xf32>
    %7 = vector.multi_reduction <add>, %0, %cst [1] : vector<16x32xf32> to vector<16xf32>
    %8 = vector.shape_cast %7 : vector<16xf32> to vector<16x1xf32>
    %cst_3 = arith.constant 3.200000e+01 : f32
    %9 = vector.broadcast %cst_3 : f32 to vector<16x1xf32>
    %10 = arith.divf %8, %9 : vector<16x1xf32>
    %11 = vector.broadcast %10 : vector<16x1xf32> to vector<16x32xf32>
    %12 = arith.subf %0, %11 : vector<16x32xf32>
    %13 = arith.mulf %12, %12 : vector<16x32xf32>
    %cst_4 = arith.constant dense<0.000000e+00> : vector<16xf32>
    %14 = vector.multi_reduction <add>, %13, %cst_4 [1] : vector<16x32xf32> to vector<16xf32>
    %15 = vector.shape_cast %14 : vector<16xf32> to vector<16x1xf32>
    %cst_5 = arith.constant 3.200000e+01 : f32
    %16 = vector.broadcast %cst_5 : f32 to vector<16x1xf32>
    %17 = arith.divf %15, %16 : vector<16x1xf32>
    %18 = vector.broadcast %10 : vector<16x1xf32> to vector<16x32xf32>
    %19 = arith.subf %0, %18 : vector<16x32xf32>
    %cst_6 = arith.constant 9.99999974E-6 : f32
    %20 = vector.broadcast %cst_6 : f32 to vector<16x1xf32>
    %21 = arith.addf %17, %20 : vector<16x1xf32>
    %22 = math.rsqrt %21 : vector<16x1xf32>
    %23 = vector.broadcast %22 : vector<16x1xf32> to vector<16x32xf32>
    %24 = arith.mulf %19, %23 : vector<16x32xf32>
    %25 = vector.broadcast %2 : vector<1x32xf32> to vector<16x32xf32>
    %26 = arith.mulf %24, %25 : vector<16x32xf32>
    %27 = vector.broadcast %3 : vector<1x32xf32> to vector<16x32xf32>
    %28 = arith.addf %26, %27 : vector<16x32xf32>
    %c0_7 = arith.constant 0 : index
    %c0_8 = arith.constant 0 : index
    %29 = vector.load %arg1[%c0_7, %c0_8] : memref<32x96xf32, #tpu.memory_space<vmem>>, vector<32x96xf32>
    %cst_9 = arith.constant dense<0.000000e+00> : vector<16x96xf32>
    %30 = tpu.matmul %28, %29, %cst_9 {dimension_numbers = #tpu.dot_dimension_numbers<[1], [0], [0], [1], [0, 0, 1, 1], [], []>} : vector<16x32xf32>, vector<32x96xf32>, vector<16x96xf32> -> vector<16x96xf32>
    %c0_10 = arith.constant 0 : index
    %c0_11 = arith.constant 0 : index
    %31 = vector.load %arg2[%c0_10, %c0_11] : memref<1x96xf32, #tpu.memory_space<vmem>>, vector<1x96xf32>
    %32 = vector.broadcast %31 : vector<1x96xf32> to vector<16x96xf32>
    %33 = arith.addf %30, %32 : vector<16x96xf32>
    %34 = vector.extract_strided_slice %33 {offsets = [0, 0], sizes = [16, 32], strides = [1, 1]} : vector<16x96xf32> to vector<16x32xf32>
    %35 = vector.extract_strided_slice %33 {offsets = [0, 32], sizes = [16, 32], strides = [1, 1]} : vector<16x96xf32> to vector<16x32xf32>
    %36 = vector.extract_strided_slice %33 {offsets = [0, 64], sizes = [16, 32], strides = [1, 1]} : vector<16x96xf32> to vector<16x32xf32>
    %c0_12 = arith.constant 0 : index
    %c0_13 = arith.constant 0 : index
    %37 = vector.load %arg4[%c0_12, %c0_13] : memref<2x32xf32, #tpu.memory_space<vmem>>, vector<2x32xf32>
    %38 = vector.extract_strided_slice %37 {offsets = [0, 0], sizes = [1, 32], strides = [1, 1]} : vector<2x32xf32> to vector<1x32xf32>
    %39 = vector.broadcast %38 : vector<1x32xf32> to vector<16x32xf32>
    %40 = arith.mulf %35, %39 : vector<16x32xf32>
    %41 = vector.extract_strided_slice %37 {offsets = [1, 0], sizes = [1, 32], strides = [1, 1]} : vector<2x32xf32> to vector<1x32xf32>
    %42 = vector.broadcast %41 : vector<1x32xf32> to vector<16x32xf32>
    %43 = arith.mulf %35, %42 : vector<16x32xf32>
    %44 = tpu.concatenate %40, %43 in 0 : vector<16x32xf32>, vector<16x32xf32> -> vector<32x32xf32>
    %45 = vector.extract_strided_slice %37 {offsets = [0, 0], sizes = [1, 32], strides = [1, 1]} : vector<2x32xf32> to vector<1x32xf32>
    %46 = vector.broadcast %45 : vector<1x32xf32> to vector<16x32xf32>
    %47 = arith.mulf %36, %46 : vector<16x32xf32>
    %48 = vector.extract_strided_slice %37 {offsets = [1, 0], sizes = [1, 32], strides = [1, 1]} : vector<2x32xf32> to vector<1x32xf32>
    %49 = vector.broadcast %48 : vector<1x32xf32> to vector<16x32xf32>
    %50 = arith.mulf %36, %49 : vector<16x32xf32>
    %51 = tpu.concatenate %47, %50 in 0 : vector<16x32xf32>, vector<16x32xf32> -> vector<32x32xf32>
    %cst_14 = arith.constant dense<0.000000e+00> : vector<16x32xf32>
    %52 = tpu.matmul %34, %44, %cst_14 {dimension_numbers = #tpu.dot_dimension_numbers<[1], [1], [0], [0], [0, 0, 1, 0], [], []>} : vector<16x32xf32>, vector<32x32xf32>, vector<16x32xf32> -> vector<16x32xf32>
    %cst_15 = arith.constant 2.500000e-01 : f32
    %53 = vector.broadcast %cst_15 : f32 to vector<16x32xf32>
    %54 = arith.mulf %52, %53 : vector<16x32xf32>
    %c0_16 = arith.constant 0 : index
    %c0_17 = arith.constant 0 : index
    %55 = vector.load %arg6[%c0_16, %c0_17] : memref<16x32xf32, #tpu.memory_space<vmem>>, vector<16x32xf32>
    %56 = arith.addf %54, %55 : vector<16x32xf32>
    %c0_18 = arith.constant 0 : index
    %c0_19 = arith.constant 0 : index
    %57 = vector.load %arg5[%c0_18, %c0_19] : memref<4x32xf32, #tpu.memory_space<vmem>>, vector<4x32xf32>
    %58 = vector.extract_strided_slice %57 {offsets = [0, 0], sizes = [1, 32], strides = [1, 1]} : vector<4x32xf32> to vector<1x32xf32>
    %59 = vector.extract_strided_slice %57 {offsets = [1, 0], sizes = [1, 32], strides = [1, 1]} : vector<4x32xf32> to vector<1x32xf32>
    %60 = vector.extract_strided_slice %57 {offsets = [2, 0], sizes = [1, 32], strides = [1, 1]} : vector<4x32xf32> to vector<1x32xf32>
    %61 = vector.extract_strided_slice %57 {offsets = [3, 0], sizes = [1, 32], strides = [1, 1]} : vector<4x32xf32> to vector<1x32xf32>
    %62 = vector.broadcast %60 : vector<1x32xf32> to vector<16x32xf32>
    %63 = arith.addf %56, %62 : vector<16x32xf32>
    %cst_20 = arith.constant dense<0xFF800000> : vector<16xf32>
    %64 = vector.multi_reduction <maximumf>, %63, %cst_20 [1] : vector<16x32xf32> to vector<16xf32>
    %65 = vector.shape_cast %64 : vector<16xf32> to vector<16x1xf32>
    %66 = vector.broadcast %61 : vector<1x32xf32> to vector<16x32xf32>
    %67 = arith.addf %56, %66 : vector<16x32xf32>
    %cst_21 = arith.constant dense<0xFF800000> : vector<16xf32>
    %68 = vector.multi_reduction <maximumf>, %67, %cst_21 [1] : vector<16x32xf32> to vector<16xf32>
    %69 = vector.shape_cast %68 : vector<16xf32> to vector<16x1xf32>
    %70 = vector.broadcast %58 : vector<1x32xf32> to vector<16x32xf32>
    %71 = vector.broadcast %65 : vector<16x1xf32> to vector<16x32xf32>
    %72 = arith.mulf %70, %71 : vector<16x32xf32>
    %73 = vector.broadcast %59 : vector<1x32xf32> to vector<16x32xf32>
    %74 = vector.broadcast %69 : vector<16x1xf32> to vector<16x32xf32>
    %75 = arith.mulf %73, %74 : vector<16x32xf32>
    %76 = arith.addf %72, %75 : vector<16x32xf32>
    %77 = arith.subf %56, %76 : vector<16x32xf32>
    %78 = math.exp %77 : vector<16x32xf32>
    %79 = vector.broadcast %58 : vector<1x32xf32> to vector<16x32xf32>
    %80 = arith.mulf %78, %79 : vector<16x32xf32>
    %cst_22 = arith.constant dense<0.000000e+00> : vector<16xf32>
    %81 = vector.multi_reduction <add>, %80, %cst_22 [1] : vector<16x32xf32> to vector<16xf32>
    %82 = vector.shape_cast %81 : vector<16xf32> to vector<16x1xf32>
    %83 = vector.broadcast %59 : vector<1x32xf32> to vector<16x32xf32>
    %84 = arith.mulf %78, %83 : vector<16x32xf32>
    %cst_23 = arith.constant dense<0.000000e+00> : vector<16xf32>
    %85 = vector.multi_reduction <add>, %84, %cst_23 [1] : vector<16x32xf32> to vector<16xf32>
    %86 = vector.shape_cast %85 : vector<16xf32> to vector<16x1xf32>
    %87 = vector.broadcast %58 : vector<1x32xf32> to vector<16x32xf32>
    %88 = vector.broadcast %82 : vector<16x1xf32> to vector<16x32xf32>
    %89 = arith.divf %87, %88 : vector<16x32xf32>
    %90 = vector.broadcast %59 : vector<1x32xf32> to vector<16x32xf32>
    %91 = vector.broadcast %86 : vector<16x1xf32> to vector<16x32xf32>
    %92 = arith.divf %90, %91 : vector<16x32xf32>
    %93 = arith.addf %89, %92 : vector<16x32xf32>
    %94 = arith.mulf %78, %93 : vector<16x32xf32>
    %cst_24 = arith.constant dense<0.000000e+00> : vector<16x32xf32>
    %95 = tpu.matmul %94, %51, %cst_24 {dimension_numbers = #tpu.dot_dimension_numbers<[1], [0], [0], [1], [0, 0, 1, 1], [], []>} : vector<16x32xf32>, vector<32x32xf32>, vector<16x32xf32> -> vector<16x32xf32>
    %96 = arith.addf %0, %95 : vector<16x32xf32>
    %cst_25 = arith.constant dense<0.000000e+00> : vector<16xf32>
    %97 = vector.multi_reduction <add>, %96, %cst_25 [1] : vector<16x32xf32> to vector<16xf32>
    %98 = vector.shape_cast %97 : vector<16xf32> to vector<16x1xf32>
    %cst_26 = arith.constant 3.200000e+01 : f32
    %99 = vector.broadcast %cst_26 : f32 to vector<16x1xf32>
    %100 = arith.divf %98, %99 : vector<16x1xf32>
    %101 = vector.broadcast %100 : vector<16x1xf32> to vector<16x32xf32>
    %102 = arith.subf %96, %101 : vector<16x32xf32>
    %103 = arith.mulf %102, %102 : vector<16x32xf32>
    %cst_27 = arith.constant dense<0.000000e+00> : vector<16xf32>
    %104 = vector.multi_reduction <add>, %103, %cst_27 [1] : vector<16x32xf32> to vector<16xf32>
    %105 = vector.shape_cast %104 : vector<16xf32> to vector<16x1xf32>
    %cst_28 = arith.constant 3.200000e+01 : f32
    %106 = vector.broadcast %cst_28 : f32 to vector<16x1xf32>
    %107 = arith.divf %105, %106 : vector<16x1xf32>
    %108 = vector.broadcast %100 : vector<16x1xf32> to vector<16x32xf32>
    %109 = arith.subf %96, %108 : vector<16x32xf32>
    %cst_29 = arith.constant 9.99999974E-6 : f32
    %110 = vector.broadcast %cst_29 : f32 to vector<16x1xf32>
    %111 = arith.addf %107, %110 : vector<16x1xf32>
    %112 = math.rsqrt %111 : vector<16x1xf32>
    %113 = vector.broadcast %112 : vector<16x1xf32> to vector<16x32xf32>
    %114 = arith.mulf %109, %113 : vector<16x32xf32>
    %115 = vector.broadcast %4 : vector<1x32xf32> to vector<16x32xf32>
    %116 = arith.mulf %114, %115 : vector<16x32xf32>
    %117 = vector.broadcast %5 : vector<1x32xf32> to vector<16x32xf32>
    %118 = arith.addf %116, %117 : vector<16x32xf32>
    %c0_30 = arith.constant 0 : index
    %c0_31 = arith.constant 0 : index
    %119 = vector.load %arg7[%c0_30, %c0_31] : memref<32x128xf32, #tpu.memory_space<vmem>>, vector<32x128xf32>
    %cst_32 = arith.constant dense<0.000000e+00> : vector<16x128xf32>
    %120 = tpu.matmul %118, %119, %cst_32 {dimension_numbers = #tpu.dot_dimension_numbers<[1], [0], [0], [1], [0, 0, 1, 1], [], []>} : vector<16x32xf32>, vector<32x128xf32>, vector<16x128xf32> -> vector<16x128xf32>
    %c0_33 = arith.constant 0 : index
    %c0_34 = arith.constant 0 : index
    %121 = vector.load %arg8[%c0_33, %c0_34] : memref<1x128xf32, #tpu.memory_space<vmem>>, vector<1x128xf32>
    %122 = vector.broadcast %121 : vector<1x128xf32> to vector<16x128xf32>
    %123 = arith.addf %120, %122 : vector<16x128xf32>
    %cst_35 = arith.constant 5.000000e-01 : f32
    %124 = vector.broadcast %cst_35 : f32 to vector<16x128xf32>
    %125 = arith.mulf %124, %123 : vector<16x128xf32>
    %cst_36 = arith.constant 0.707106769 : f32
    %126 = vector.broadcast %cst_36 : f32 to vector<16x128xf32>
    %127 = arith.mulf %123, %126 : vector<16x128xf32>
    %128 = math.erf %127 : vector<16x128xf32>
    %cst_37 = arith.constant 1.000000e+00 : f32
    %129 = vector.broadcast %cst_37 : f32 to vector<16x128xf32>
    %130 = arith.addf %129, %128 : vector<16x128xf32>
    %131 = arith.mulf %125, %130 : vector<16x128xf32>
    %c0_38 = arith.constant 0 : index
    %c0_39 = arith.constant 0 : index
    %132 = vector.load %arg9[%c0_38, %c0_39] : memref<128x32xf32, #tpu.memory_space<vmem>>, vector<128x32xf32>
    %cst_40 = arith.constant dense<0.000000e+00> : vector<16x32xf32>
    %133 = tpu.matmul %131, %132, %cst_40 {dimension_numbers = #tpu.dot_dimension_numbers<[1], [0], [0], [1], [0, 0, 1, 1], [], []>} : vector<16x128xf32>, vector<128x32xf32>, vector<16x32xf32> -> vector<16x32xf32>
    %134 = vector.broadcast %6 : vector<1x32xf32> to vector<16x32xf32>
    %135 = arith.addf %133, %134 : vector<16x32xf32>
    %136 = arith.addf %96, %135 : vector<16x32xf32>
    %c0_41 = arith.constant 0 : index
    %c0_42 = arith.constant 0 : index
    %137 = vector.load %arg10[%c0_41, %c0_42] : memref<16x32xf32, #tpu.memory_space<vmem>>, vector<16x32xf32>
    tpu.vector_store %arg10[%c0_41, %c0_42], %136 {strides = array<i32>} : memref<16x32xf32, #tpu.memory_space<vmem>>, vector<16x32xf32>,
    return
  }
}

</mosaic_0001>

<bundles_post_ra>
// kernel: tpu_custom_call.1
= control target key start
LH: loop header
LB: loop body
LE: loop exit
PB: predicated region body
PF: predicated region fallthrough
CT: control target
= control target key end

     0   :  { %vm39_vm0 = vcmask 261120   ;;  %s1216_s0 = inlined_call_operand.vmem [shape: f32[16,32], index: 0, kind: input, shape index: {}]   ;;  %s1217_s1 = inlined_call_operand.vmem [shape: f32[32,96], index: 1, kind: input, shape index: {}]   ;;  %s1218_s2 = inlined_call_operand.vmem [shape: f32[1,96], index: 2, kind: input, shape index: {}]   ;;  %s1219_s3 = inlined_call_operand.vmem [shape: f32[5,32], index: 3, kind: input, shape index: {}]   ;;  %s1220_s4 = inlined_call_operand.vmem [shape: f32[2,32], index: 4, kind: input, shape index: {}]   ;;  %s1221_s5 = inlined_call_operand.vmem [shape: f32[4,32], index: 5, kind: input, shape index: {}]   ;;  %s1222_s6 = inlined_call_operand.vmem [shape: f32[16,32], index: 6, kind: input, shape index: {}]   ;;  %s1223_s7 = inlined_call_operand.vmem [shape: f32[32,128], index: 7, kind: input, shape index: {}]   ;;  %s1224_s8 = inlined_call_operand.vmem [shape: f32[1,128], index: 8, kind: input, shape index: {}]   ;;  %s1225_s9 = inlined_call_operand.vmem [shape: f32[128,32], index: 9, kind: input, shape index: {}]   ;;  %s1226_s10 = inlined_call_operand.hbm [shape: f32[16,32], index: 10, kind: output, shape index: {}]  }
   0x1   :  { %v987_v0 = vld [vmem:[%s1216_s0] sm:$0xff]  ;;  %v992_v1 = vld [vmem:[%s1216_s0 + $0x8] sm:$0xff] }
   0x2   :  { %15 = vsyncpa [#allocation3], 0  ;;  %v40_v2 = vsel %vm39_vm0, %v987_v0, 0.0  ;;  %v43_v3 = vsel %vm39_vm0, %v992_v1, 0.0  ;;  %v82_v14 = vld [vmem:[%s1217_s1 + $0x18] sm:$0xff]  ;;  %v81_v15 = vld [vmem:[%s1217_s1 + $0x10] sm:$0xff]  ;;  %v67_v17 = vlaneseq }
   0x3   :  { %41 = vadd.xlane.f32.xlu0 %v40_v2  ;;  %792 = vmatprep.subr.mxu0 %v82_v14  ;;  %v80_v16 = vld [vmem:[%s1217_s1 + $0x8] sm:$0xff]  ;;  %v79_v19 = vld [vmem:[%s1217_s1] sm:$0xff]  ;;  %s923_s26 = smov 32   ;;  %s924_s28 = smov 96  }
   0x4   :  { %793 = vmatpush3.msra.mxu0 %v82_v14  ;;  %v1011_v18 = vshrl.u32 %v67_v17, 7  ;;  %v171_v22 = vld [vmem:[%s1220_s4] sm:$0x3]  ;;  %v306_v61 = vld [vmem:[%s1222_s6 + $0x8] sm:$0xff] }
   0x5   :  { %794 = vmatprep.subr.mxu0 %v81_v15  ;;  %v1036_v31 = vld [vmem:[%s1219_s3] sm:$0x1f] }
   0x6   :  { %795 = vmatpush3.msra.mxu0 %v81_v15  ;;  %v1017_v20 = vsub.s32 0, %v1011_v18  ;;  %v1020_v21 = vsub.s32 1, %v1011_v18  ;;  %v736_v42 = vld [vmem:[%s1218_s2] ss:$0 sm:$0xff]  ;;  %v324_v59 = vsub.s32 3, %v1011_v18  ;;  %v312_v60 = vsub.s32 2, %v1011_v18 }
   0x7   :  { %44 = vadd.xlane.f32.xlu0 %v43_v3  ;;  %796 = vmatprep.subr.mxu0 %v80_v16  ;;  %v305_v63 = vld [vmem:[%s1222_s6] sm:$0xff] }
   0x8   :  { %797 = vmatpush3.msra.mxu0 %v80_v16  ;;  %v1026_v23 = vrot.slane %v171_v22, %v1020_v21  ;;  %v1029_v24 = vrot.slane %v171_v22, %v1017_v20  ;;  %v70_v32 = vrot.slane %v1036_v31, %v1017_v20  ;;  %v76_v35 = vrot.slane %v1036_v31, %v1020_v21  ;;  %v309_v2 = vld [vmem:[%s1221_s5] sm:$0xf]  ;;  %s925_s5 = smov 64  }
   0x9   :  { %798 = vmatprep.subr.mxu0 %v79_v19  ;;  %v1091_v16 = vrot.slane %v309_v2, %v1017_v20  ;;  %v1094_v17 = vrot.slane %v309_v2, %v1020_v21 }
   0xa   :  { %799 = vmatpush3.msra.mxu0 %v79_v19 }
  0x1d   :  { %187 = vrot.lane.b32.xlu0 %v1026_v23, %s923_s26 }
  0x8c   :  { %v42_v4 = vpop.xlane.xlu0 %41 }
  0x8d   :  { %v47_v5 = vmul.f32 0.03125, %v42_v4 }
  0x8f   :  { %v49_v6 = vsub.f32 %v987_v0, %v47_v5 }
  0x90   :  { %v45_v7 = vpop.xlane.xlu0 %44 }
  0x91   :  { %v48_v8 = vmul.f32 0.03125, %v45_v7  ;;  %v51_v9 = vmul.f32 %v49_v6, %v49_v6  ;;  %v313_v7 = vrot.slane %v309_v2, %v312_v60 }
  0x93   :  { %v50_v10 = vsub.f32 %v992_v1, %v48_v8  ;;  %v53_v11 = vsel %vm39_vm0, %v51_v9, 0.0 }
  0x94   :  { %54 = vadd.xlane.f32.xlu1 %v53_v11  ;;  %v188_v45 = vpop.permute.xlu0 %187 }
  0x95   :  { %v52_v12 = vmul.f32 %v50_v10, %v50_v10 }
  0x97   :  { %v56_v13 = vsel %vm39_vm0, %v52_v12, 0.0 }
  0x98   :  { %57 = vadd.xlane.f32.xlu1 %v56_v13 }
  0xa9   :  { %177 = vrot.lane.b32.xlu1 %v1029_v24, %s923_s26 }
 0x11d   :  { %v55_v25 = vpop.xlane.xlu1 %54 }
 0x11e   :  { %v59_v26 = vmul.f32 0.03125, %v55_v25 }
 0x120   :  { %v61_v27 = vadd.f32 1e-05, %v59_v26 }
 0x121   :  { %v58_v28 = vpop.xlane.xlu1 %57 }
 0x122   :  { %877 = vrsqrt.f32 %v61_v27  ;;  %v60_v29 = vmul.f32 0.03125, %v58_v28 }
 0x124   :  { %v62_v30 = vadd.f32 1e-05, %v60_v29 }
 0x125   :  { %v178_v43 = vpop.permute.xlu1 %177 }
 0x126   :  { %879 = vrsqrt.f32 %v62_v30 }
 0x12f   :  { %v878_v33 = vpop.eup %877 }
 0x130   :  { %v65_v34 = vmul.f32 %v878_v33, %v49_v6  ;;  %v325_v6 = vrot.slane %v309_v2, %v324_v59 }
 0x132   :  { %v71_v36 = vmul.f32 %v70_v32, %v65_v34 }
 0x133   :  { %v880_v37 = vpop.eup %879 }
 0x134   :  { %v66_v38 = vmul.f32 %v880_v37, %v50_v10  ;;  %v77_v39 = vadd.f32 %v76_v35, %v71_v36 }
 0x136   :  { %v72_v40 = vmul.f32 %v70_v32, %v66_v38  ;;  %800 = vmatprep.mubr.msk.f32.mxu0 %vm39_vm0, %v77_v39 }
 0x138   :  { %v78_v41 = vadd.f32 %v76_v35, %v72_v40 }
 0x13a   :  { %801 = vmatmul.mubr.msk.f32.vlgmr.msra.gmra.mxu0 %vm39_vm0, %v78_v41 }
 0x1fa   :  { %v802_v44 = vpop.f32.mrf.mxu0 }
 0x1fb   :  { %v1047_v46 = vadd.f32 %v802_v44, %v736_v42 }
 0x1fc   :  { %v162_v47 = vpop.f32.mrf.mxu0 }
 0x1fd   :  { %v1049_v48 = vadd.f32 %v736_v42, %v162_v47  ;;  %v181_v49 = vmul.f32 %v178_v43, %v1047_v46  ;;  %v191_v50 = vmul.f32 %v188_v45, %v1047_v46 }
 0x1ff   :  { %811 = vmatprep.mubr.msk.f32.mxu0 %vm39_vm0, %v1049_v48  ;;  %208 = vrot.lane.b32.xlu0 %v181_v49, %s924_s28  ;;  %v190_v51 = vmul.f32 %v188_v45, %v1049_v48  ;;  %v180_v52 = vmul.f32 %v178_v43, %v1049_v48 }
 0x200   :  { %212 = vrot.lane.b32.xlu1 %v191_v50, %s924_s28 }
 0x204   :  { %210 = vrot.lane.b32.xlu1 %v190_v51, %s924_s28 }
 0x208   :  { %206 = vrot.lane.b32.xlu1 %v180_v52, %s924_s28 }
 0x271   :  { %v209_v55 = vpop.permute.xlu0 %208 }
 0x272   :  { %v213_v53 = vpop.permute.xlu1 %212 }
 0x273   :  { %803 = vmatprep.subr.msk.mxu0 %vm39_vm0, %v213_v53 }
 0x274   :  { %804 = vmatpush3.xpose.msk.msra.mxu0 %vm39_vm0, %v213_v53 }
 0x276   :  { %v211_v54 = vpop.permute.xlu1 %210 }
 0x277   :  { %805 = vmatprep.subr.msk.mxu0 %vm39_vm0, %v211_v54 }
 0x278   :  { %806 = vmatpush3.xpose.msk.msra.mxu0 %vm39_vm0, %v211_v54 }
 0x279   :  { %807 = vmatprep.subr.msk.mxu0 %vm39_vm0, %v209_v55 }
 0x27a   :  { %v207_v56 = vpop.permute.xlu1 %206 }
 0x27c   :  { %808 = vmatpush3.xpose.msk.msra.mxu0 %vm39_vm0, %v209_v55 }
 0x27d   :  { %809 = vmatprep.subr.msk.mxu0 %vm39_vm0, %v207_v56 }
 0x280   :  { %810 = vmatpush3.xpose.msk.msra.mxu0 %vm39_vm0, %v207_v56 }
 0x283   :  { %812 = vmatmul.mubr.msk.f32.vlgmr.msra.gmra.mxu0 %vm39_vm0, %v1047_v46 }
 0x343   :  { %v813_v57 = vpop.f32.mrf.mxu0 }
 0x344   :  { %v304_v58 = vmul.f32 0.25, %v813_v57 }
 0x345   :  { %v294_v62 = vpop.f32.mrf.mxu0 }
 0x346   :  { %v303_v3 = vmul.f32 0.25, %v294_v62  ;;  %v308_v4 = vadd.f32 %v306_v61, %v304_v58 }
 0x348   :  { %v307_v5 = vadd.f32 %v305_v63, %v303_v3  ;;  %v315_v12 = vadd.f32 %v313_v7, %v308_v4  ;;  %v327_v14 = vadd.f32 %v325_v6, %v308_v4 }
 0x34a   :  { %v326_v8 = vadd.f32 %v325_v6, %v307_v5  ;;  %v314_v9 = vadd.f32 %v313_v7, %v307_v5  ;;  %v319_v13 = vsel %vm39_vm0, %v315_v12, -inf  ;;  %v331_v15 = vsel %vm39_vm0, %v327_v14, -inf }
 0x34c   :  { %v328_v10 = vsel %vm39_vm0, %v326_v8, -inf  ;;  %v316_v11 = vsel %vm39_vm0, %v314_v9, -inf }
 0x34d   :  { %329 = vmax.xlane.f32.xlu1 %v328_v10  ;;  %317 = vmax.xlane.f32.xlu0 %v316_v11 }
 0x351   :  { %320 = vmax.xlane.f32.xlu0 %v319_v13 }
 0x355   :  { %332 = vmax.xlane.f32.xlu0 %v331_v15 }
 0x35e   :  { %192 = vrot.lane.b32.xlu1 %v1029_v24, %s925_s5 }
 0x36b   :  { %197 = vrot.lane.b32.xlu0 %v1026_v23, %s925_s5 }
 0x3d6   :  { %v330_v19 = vpop.xlane.xlu1 %329  ;;  %v318_v22 = vpop.xlane.xlu0 %317 }
 0x3d7   :  { %v344_v25 = vmul.f32 %v1094_v17, %v330_v19  ;;  %v338_v26 = vmul.f32 %v1091_v16, %v318_v22 }
 0x3d9   :  { %v346_v27 = vadd.f32 %v344_v25, %v338_v26 }
 0x3da   :  { %v321_v28 = vpop.xlane.xlu0 %320  ;;  %v193_v47 = vpop.permute.xlu1 %192 }
 0x3db   :  { %v348_v29 = vsub.f32 %v307_v5, %v346_v27  ;;  %v339_v24 = vmul.f32 %v1091_v16, %v321_v28  ;;  %v196_v49 = vmul.f32 %v193_v47, %v1047_v46  ;;  %v195_v51 = vmul.f32 %v193_v47, %v1049_v48 }
 0x3dd   :  { %v350_v20 = vmul.f32 1.442695, %v348_v29  ;;  %v522_v29 = vld [vmem:[%s1223_s7 + $0x18] sm:$0xff] }
 0x3de   :  { %v333_v30 = vpop.xlane.xlu0 %332 }
 0x3df   :  { %v345_v23 = vmul.f32 %v1094_v17, %v333_v30  ;;  %881 = vpow2.f32 %v350_v20  ;;  %v521_v30 = vld [vmem:[%s1223_s7 + $0x10] sm:$0xff] }
 0x3e0   :  { %v635_v20 = vld [vmem:[%s1225_s9 + $0x70] sm:$0xff] }
 0x3e1   :  { %v347_v32 = vadd.f32 %v345_v23, %v339_v24  ;;  %v520_v24 = vld [vmem:[%s1223_s7 + $0x8] sm:$0xff]  ;;  %v519_v23 = vld [vmem:[%s1223_s7] sm:$0xff] }
 0x3e2   :  { %v198_v44 = vpop.permute.xlu0 %197 }
 0x3e3   :  { %v349_v33 = vsub.f32 %v308_v4, %v347_v32  ;;  %v200_v45 = vmul.f32 %v198_v44, %v1049_v48  ;;  %v201_v50 = vmul.f32 %v198_v44, %v1047_v46  ;;  %v636_v32 = vld [vmem:[%s1225_s9 + $0x78] sm:$0xff] }
 0x3e4   :  { %836 = vmatprep.subr.mxu1 %v636_v32 }
 0x3e5   :  { %v352_v34 = vmul.f32 1.442695, %v349_v33  ;;  %837 = vmatpush3.msra.mxu1 %v636_v32  ;;  %v634_v33 = vld [vmem:[%s1225_s9 + $0x68] sm:$0xff] }
 0x3e6   :  { %838 = vmatprep.subr.mxu1 %v635_v20 }
 0x3e7   :  { %883 = vpow2.f32 %v352_v34  ;;  %839 = vmatpush3.msra.mxu1 %v635_v20 }
 0x3e8   :  { %840 = vmatprep.subr.mxu1 %v634_v33 }
 0x3e9   :  { %841 = vmatpush3.msra.mxu1 %v634_v33 }
 0x3ec   :  { %v882_v21 = vpop.eup %881 }
 0x3ed   :  { %v354_v40 = vmul.f32 %v882_v21, %v1091_v16  ;;  %v362_v41 = vmul.f32 %v882_v21, %v1094_v17 }
 0x3ef   :  { %v356_v42 = vsel %vm39_vm0, %v354_v40, 0.0  ;;  %v364_v43 = vsel %vm39_vm0, %v362_v41, 0.0  ;;  %v516_v41 = vrot.slane %v1036_v31, %v324_v59  ;;  %v632_v59 = vld [vmem:[%s1225_s9 + $0x58] sm:$0xff] }
 0x3f4   :  { %v884_v35 = vpop.eup %883 }
 0x3f5   :  { %v363_v36 = vmul.f32 %v884_v35, %v1094_v17  ;;  %v355_v37 = vmul.f32 %v884_v35, %v1091_v16 }
 0x3f7   :  { %v367_v38 = vsel %vm39_vm0, %v363_v36, 0.0  ;;  %v359_v39 = vsel %vm39_vm0, %v355_v37, 0.0 }
 0x3f8   :  { %368 = vadd.xlane.f32.xlu1 %v367_v38  ;;  %360 = vadd.xlane.f32.xlu0 %v359_v39  ;;  %v510_v39 = vrot.slane %v1036_v31, %v312_v60  ;;  %v633_v60 = vld [vmem:[%s1225_s9 + $0x60] sm:$0xff] }
 0x3f9   :  { %842 = vmatprep.subr.mxu1 %v633_v60 }
 0x3fa   :  { %843 = vmatpush3.msra.mxu1 %v633_v60 }
 0x3fb   :  { %844 = vmatprep.subr.mxu1 %v632_v59 }
 0x3fc   :  { %357 = vadd.xlane.f32.xlu1 %v356_v42  ;;  %365 = vadd.xlane.f32.xlu0 %v364_v43 }
 0x3fd   :  { %845 = vmatpush3.msra.mxu1 %v632_v59 }
 0x40d   :  { %390 = vrot.lane.b32.xlu1 %v200_v45, %s925_s5 }
 0x411   :  { %388 = vrot.lane.b32.xlu1 %v196_v49, %s925_s5 }
 0x412   :  { %392 = vrot.lane.b32.xlu0 %v201_v50, %s925_s5 }
 0x415   :  { %386 = vrot.lane.b32.xlu1 %v195_v51, %s925_s5  ;;  %v631_v51 = vld [vmem:[%s1225_s9 + $0x50] sm:$0xff] }
 0x416   :  { %846 = vmatprep.subr.mxu1 %v631_v51 }
 0x417   :  { %847 = vmatpush3.msra.mxu1 %v631_v51 }
 0x481   :  { %v369_v52 = vpop.xlane.xlu1 %368  ;;  %v361_v53 = vpop.xlane.xlu0 %360 }
 0x482   :  { %885 = vrcp.f32 %v369_v52  ;;  %v630_v52 = vld [vmem:[%s1225_s9 + $0x48] sm:$0xff] }
 0x483   :  { %887 = vrcp.f32 %v361_v53  ;;  %848 = vmatprep.subr.mxu1 %v630_v52  ;;  %v629_v53 = vld [vmem:[%s1225_s9 + $0x40] sm:$0xff] }
 0x484   :  { %849 = vmatpush3.msra.mxu1 %v630_v52 }
 0x485   :  { %v358_v54 = vpop.xlane.xlu1 %357  ;;  %v366_v55 = vpop.xlane.xlu0 %365  ;;  %850 = vmatprep.subr.mxu1 %v629_v53 }
 0x486   :  { %889 = vrcp.f32 %v358_v54  ;;  %v628_v54 = vld [vmem:[%s1225_s9 + $0x38] sm:$0xff]  ;;  %851 = vmatpush3.msra.mxu1 %v629_v53 }
 0x487   :  { %891 = vrcp.f32 %v366_v55  ;;  %v627_v55 = vld [vmem:[%s1225_s9 + $0x30] sm:$0xff]  ;;  %852 = vmatprep.subr.mxu1 %v628_v54 }
 0x488   :  { %853 = vmatpush3.msra.mxu1 %v628_v54 }
 0x489   :  { %v391_v56 = vpop.permute.xlu1 %390  ;;  %v393_v57 = vpop.permute.xlu0 %392  ;;  %854 = vmatprep.subr.mxu1 %v627_v55 }
 0x48a   :  { %814 = vmatprep.subr.mxu0 %v393_v57  ;;  %855 = vmatpush3.msra.mxu1 %v627_v55 }
 0x48b   :  { %815 = vmatpush3.msra.mxu0 %v393_v57  ;;  %v625_v57 = vld [vmem:[%s1225_s9 + $0x20] sm:$0xff] }
 0x48c   :  { %816 = vmatprep.subr.mxu0 %v391_v56 }
 0x48d   :  { %v389_v46 = vpop.permute.xlu1 %388  ;;  %817 = vmatpush3.msra.mxu0 %v391_v56  ;;  %v626_v56 = vld [vmem:[%s1225_s9 + $0x28] sm:$0xff] }
 0x48e   :  { %818 = vmatprep.subr.mxu0 %v389_v46  ;;  %856 = vmatprep.subr.mxu1 %v626_v56 }
 0x48f   :  { %v886_v58 = vpop.eup %885  ;;  %819 = vmatpush3.msra.mxu0 %v389_v46  ;;  %857 = vmatpush3.msra.mxu1 %v626_v56  ;;  %v624_v46 = vld [vmem:[%s1225_s9 + $0x18] sm:$0xff] }
 0x490   :  { %v888_v48 = vpop.eup %887  ;;  %v377_v62 = vmul.f32 %v886_v58, %v1094_v17  ;;  %858 = vmatprep.subr.mxu1 %v625_v57  ;;  %v623_v58 = vld [vmem:[%s1225_s9 + $0x10] sm:$0xff] }
 0x491   :  { %v387_v61 = vpop.permute.xlu1 %386  ;;  %v373_v63 = vmul.f32 %v888_v48, %v1091_v16  ;;  %859 = vmatpush3.msra.mxu1 %v625_v57  ;;  %v622_v48 = vld [vmem:[%s1225_s9 + $0x8] sm:$0xff] }
 0x492   :  { %820 = vmatprep.subr.mxu0 %v387_v61  ;;  %860 = vmatprep.subr.mxu1 %v624_v46 }
 0x493   :  { %v890_v2 = vpop.eup %889  ;;  %821 = vmatpush3.msra.mxu0 %v387_v61  ;;  %v379_v6 = vadd.f32 %v377_v62, %v373_v63  ;;  %861 = vmatpush3.msra.mxu1 %v624_v46  ;;  %v621_v61 = vld [vmem:[%s1225_s9] sm:$0xff] }
 0x494   :  { %v892_v3 = vpop.eup %891  ;;  %v371_v4 = vmul.f32 %v890_v2, %v1091_v16  ;;  %825 = vmatprep.subr.mxu0 %v522_v29  ;;  %862 = vmatprep.subr.mxu1 %v623_v58  ;;  %v747_v62 = vld [vmem:[%s1224_s8] ss:$0 sm:$0xff]  ;;  %s926_s8 = smov [#allocation2]  }
 0x495   :  { %v375_v5 = vmul.f32 %v892_v3, %v1094_v17  ;;  %v381_v9 = vmul.f32 %v884_v35, %v379_v6  ;;  %863 = vmatpush3.msra.mxu1 %v623_v58  ;;  %s725_s9 = sshll.u32 %s926_s8, 4  ;;  %s726_s9 = int_to_ptr.vmem [resolvable:$true] %s725_s9 }
 0x496   :  { %864 = vmatprep.subr.mxu1 %v622_v48  ;;  %s901_s7 = scalar_lea.vmem %s726_s9, 256  ;;  %p906_p1 = scmp.lt.s32.totalorder %s726_s9, %s726_s9 }
 0x497   :  { %v378_v7 = vadd.f32 %v375_v5, %v371_v4  ;;  %865 = vmatpush3.msra.mxu1 %v622_v48  ;;  %p902_p0 = scmp.ne.s32.totalorder %s726_s9, %s901_s7  ;;  %p907_p2 = scmp.lt.s32.totalorder %s901_s7, %s901_s7 }
 0x498   :  { %866 = vmatprep.subr.mxu1 %v621_v61 }
 0x499   :  { %v380_v8 = vmul.f32 %v882_v21, %v378_v7  ;;  %867 = vmatpush3.msra.mxu1 %v621_v61  ;;  %p908_p3 = por %p907_p2, %p906_p1 }
 0x49b   :  { %822 = vmatprep.mubr.msk.f32.mxu0 %vm39_vm0, %v380_v8  ;;  %p909_p4 = pnand %p908_p3, %p902_p0 }
 0x49c   :  { %823 = vmatmul.mubr.msk.f32.vlgmr.msra.gmra.mxu0 %vm39_vm0, %v381_v9 }
 0x49d   :  { %826 = vmatpush3.msra.mxu0 %v522_v29 }
 0x49e   :  { %827 = vmatprep.subr.mxu0 %v521_v30 }
 0x49f   :  { %828 = vmatpush3.msra.mxu0 %v521_v30 }
 0x4a0   :  { %829 = vmatprep.subr.mxu0 %v520_v24 }
 0x4a1   :  { %830 = vmatpush3.msra.mxu0 %v520_v24 }
 0x4a2   :  { %831 = vmatprep.subr.mxu0 %v519_v23 }
 0x4a3   :  { %832 = vmatpush3.msra.mxu0 %v519_v23 }
 0x55c   :  { %v824_v10 = vpop.f32.mrf.mxu0 }
 0x55d   :  { %v1123_v11 = vadd.f32 %v824_v10, %v992_v1 }
 0x55e   :  { %v470_v12 = vpop.f32.mrf.mxu0 }
 0x55f   :  { %v1126_v13 = vadd.f32 %v470_v12, %v987_v0  ;;  %v484_v14 = vsel %vm39_vm0, %v1123_v11, 0.0 }
 0x560   :  { %485 = vadd.xlane.f32.xlu1 %v484_v14 }
 0x561   :  { %v481_v15 = vsel %vm39_vm0, %v1126_v13, 0.0 }
 0x562   :  { %482 = vadd.xlane.f32.xlu0 %v481_v15 }
 0x5e9   :  { %v486_v16 = vpop.xlane.xlu1 %485 }
 0x5ea   :  { %v488_v17 = vmul.f32 0.03125, %v486_v16 }
 0x5eb   :  { %v483_v19 = vpop.xlane.xlu0 %482 }
 0x5ec   :  { %v487_v22 = vmul.f32 0.03125, %v483_v19  ;;  %v490_v25 = vsub.f32 %v1123_v11, %v488_v17  ;;  %v639_v17 = vsub.s32 4, %v1011_v18 }
 0x5ee   :  { %v489_v1 = vsub.f32 %v1126_v13, %v487_v22  ;;  %v492_v27 = vmul.f32 %v490_v25, %v490_v25  ;;  %v640_v19 = vrot.slane %v1036_v31, %v639_v17 }
 0x5f0   :  { %v491_v26 = vmul.f32 %v489_v1, %v489_v1  ;;  %v496_v28 = vsel %vm39_vm0, %v492_v27, 0.0 }
 0x5f2   :  { %v493_v0 = vsel %vm39_vm0, %v491_v26, 0.0 }
 0x5f3   :  { %494 = vadd.xlane.f32.xlu0 %v493_v0 }
 0x5f7   :  { %497 = vadd.xlane.f32.xlu0 %v496_v28 }
 0x67c   :  { %v495_v34 = vpop.xlane.xlu0 %494 }
 0x67d   :  { %v499_v21 = vmul.f32 0.03125, %v495_v34 }
 0x67f   :  { %v501_v35 = vadd.f32 1e-05, %v499_v21 }
 0x680   :  { %v498_v36 = vpop.xlane.xlu0 %497 }
 0x681   :  { %893 = vrsqrt.f32 %v501_v35  ;;  %v500_v37 = vmul.f32 0.03125, %v498_v36 }
 0x683   :  { %v502_v38 = vadd.f32 1e-05, %v500_v37 }
 0x685   :  { %895 = vrsqrt.f32 %v502_v38 }
 0x68e   :  { %v894_v40 = vpop.eup %893 }
 0x68f   :  { %v505_v42 = vmul.f32 %v894_v40, %v489_v1 }
 0x691   :  { %v511_v43 = vmul.f32 %v510_v39, %v505_v42 }
 0x692   :  { %v896_v44 = vpop.eup %895 }
 0x693   :  { %v506_v45 = vmul.f32 %v896_v44, %v490_v25  ;;  %v517_v47 = vadd.f32 %v516_v41, %v511_v43 }
 0x695   :  { %833 = vmatprep.mubr.msk.f32.mxu0 %vm39_vm0, %v517_v47  ;;  %v512_v49 = vmul.f32 %v510_v39, %v506_v45 }
 0x697   :  { %v518_v50 = vadd.f32 %v516_v41, %v512_v49 }
 0x699   :  { %834 = vmatmul.mubr.msk.f32.vlgmr.msra.gmra.mxu0 %vm39_vm0, %v518_v50 }
 0x759   :  { %v835_v63 = vpop.f32.mrf.mxu0 }
 0x75a   :  { %v608_v2 = vadd.f32 %v835_v63, %v747_v62 }
 0x75b   :  { %v602_v3 = vpop.f32.mrf.mxu0 }
 0x75c   :  { %v614_v4 = vmul.f32 0.70710677, %v608_v2  ;;  %v603_v5 = vadd.f32 %v747_v62, %v602_v3  ;;  %v612_v14 = vmul.f32 0.5, %v608_v2 }
 0x75e   :  { %897 = verf.f32 %v614_v4  ;;  %v613_v6 = vmul.f32 0.70710677, %v603_v5  ;;  %v611_v10 = vmul.f32 0.5, %v603_v5 }
 0x760   :  { %899 = verf.f32 %v613_v6 }
 0x76b   :  { %v898_v7 = vpop.eup %897 }
 0x76c   :  { %v618_v9 = vadd.f32 1.0, %v898_v7 }
 0x76d   :  { %v900_v8 = vpop.eup %899 }
 0x76e   :  { %v617_v12 = vadd.f32 1.0, %v900_v8  ;;  %v620_v16 = vmul.f32 %v618_v9, %v612_v14 }
 0x770   :  { %v619_v15 = vmul.f32 %v617_v12, %v611_v10 }
 0x772   :  { %868 = vmatprep.mubr.f32.mxu1 %v619_v15 }
 0x773   :  { %869 = vmatmul.mubr.f32.vlgmr.msra.gmra.mxu1 %v620_v16 }
 0x833   :  { %v870_v22 = vpop.f32.mrf.mxu1 }
 0x834   :  { %v713_v25 = vadd.f32 %v870_v22, %v640_v19 }
 0x835   :  { %v707_v1 = vpop.f32.mrf.mxu1 }
 0x836   :  { %v717_v26 = vadd.f32 %v713_v25, %v1123_v11  ;;  %v708_v0 = vadd.f32 %v707_v1, %v640_v19 }
 0x838   :  { %719 = vst.msk [vmem:[#allocation2 + $0x8] sm:$0xff] %vm39_vm0, %v717_v26  ;;  %v716_v27 = vadd.f32 %v708_v0, %v1126_v13 }
 0x83a   :  { %718 = vst.msk [vmem:[#allocation2] sm:$0xff] %vm39_vm0, %v716_v27 }
 0x83b   :  { %912 = shalt.err (!%p909_p4)
}
 0x83c   :  { %s927_s26 = smov 128   ;;  %s928_s1 = smov 8  }
 0x83d   :  { %731 = dma.vmem_to_hbm [thread:$0]  %s726_s9, 256, %s1226_s10, [#allocation3], %s927_s26, %s927_s26, %s928_s1  }
 0x83e   :  { %921 = dma.done.wait [#allocation3], 256  }
 0x83f   :  { %922 = vsyncadd [#allocation3], 4294967040 }
 0x840   :  { %735 = vsyncpa [#allocation3], 1 }

</bundles_post_ra>
